<compile_context>
chip_gen: v7x
topology: tpu7x:2x2x1
jax: 0.10.0
libtpu: 0.0.40
codegen_flags: <defaults>
</compile_context>

<pallas_src>
import jax
import jax.numpy as jnp
from jax import lax
from jax.experimental import pallas as pl
from jax.experimental.pallas import tpu as pltpu


def _rows_to_lane_slab(x):
    """Row-major flatten (R, C) -> (1, R*C) using ops that lower unconditionally.

    A plain jnp.reshape here would need a sublane->lane relayout (C < 128) whose
    Mosaic support is toolchain dependent.  Instead:
      1. lane-replicate each row R times with one tiny MXU matmul against an
         iota-built 0/1 selection matrix, then
      2. keep only lanes [r*C, (r+1)*C) of row r and fold the rows together.
    """
    R, C = x.shape
    N = R * C
    # Column-selection matrix: sel[c, j] = 1 iff (j mod C) == c.
    j_cols = lax.broadcasted_iota(jnp.int32, (C, N), 1)
    c_rows = lax.broadcasted_iota(jnp.int32, (C, N), 0)
    if (C & (C - 1)) == 0:                       # power of two -> cheap bit op
        j_mod_c = j_cols & (C - 1)
    else:
        j_mod_c = j_cols % C
    sel = (j_mod_c == c_rows).astype(x.dtype)                        # (C, N)
    tiled = jnp.dot(x, sel, preferred_element_type=jnp.float32)      # (R, N); row r = x[r,:] tiled
    # Keep lanes [r*C, (r+1)*C) of row r, zero the rest, sum over rows.
    r_idx = lax.broadcasted_iota(jnp.int32, (R, N), 0)
    j_idx = lax.broadcasted_iota(jnp.int32, (R, N), 1)
    keep = (j_idx >= r_idx * C) & (j_idx < (r_idx + 1) * C)
    return jnp.sum(jnp.where(keep, tiled, 0.0), axis=0, keepdims=True)  # (1, N)


def _attn_kernel(full_ref, last_ref, wcat_ref, bsum_ref, v_ref, bv_ref, out_ref):
    # full_ref : (BB, T, D)      last_ref : (BB, 1, D)
    # wcat_ref : (D, 2H) = [W1^T | W2^T]
    # bsum_ref : (1, H)  = b1 + b2        v_ref : (1, H)
    # bv_ref   : (1, 1) scalar in SMEM
    # out_ref  : (1, 1, BB*D) lane-dense slab, or (BB, D) when D % 128 == 0.
    BB, T, D = full_ref.shape
    H = wcat_ref.shape[1] // 2

    # bf16 inputs (v6e/v7x streaming) are upcast here; math stays f32.
    full = full_ref[...].astype(jnp.float32)                          # (BB, T, D)
    last2d = last_ref[:, 0, :].astype(jnp.float32)                    # (BB, D)

    # Fused projection: ONE MXU call computes both W1(last) and W2(full).
    # (At production D/H this doubles the projection flops -- the unused half
    #  of the 2H output columns -- so revert to two dots once the MXU stops
    #  being idle; at these sizes one MXU pass beats a 4-row standalone dot.)
    stacked = jnp.concatenate([last2d, full.reshape(BB * T, D)], axis=0)   # (BB*(T+1), D)
    proj = jnp.dot(stacked, wcat_ref[...],
                   preferred_element_type=jnp.float32)                     # (BB*(T+1), 2H)
    h1 = proj[:BB, :H]                                                # W1(last)  (BB, H)
    h2 = proj[BB:, H:].reshape(BB, T, H)                              # W2(full)  (BB, T, H)

    t = jnp.tanh(h1[:, None, :] + h2 + bsum_ref[...])                 # (BB, T, H)

    # scores[b, t] = t[b, t, :] . v + bv   (VPU multiply + lane reduce; a
    # 1-wide MXU matmul would waste a full MXU pass).
    scores = jnp.sum(t * v_ref[...], axis=-1) + bv_ref[0, 0]          # (BB, T)

    # Softmax over the sequence axis (torch dim=1), exact normalization.
    m = jnp.max(scores, axis=1, keepdims=True)
    p = jnp.exp(scores - m)
    attn = p / jnp.sum(p, axis=1, keepdims=True)                      # (BB, T)

    # context[b, :] = sum_t attn[b, t] * full[b, t, :].
    # VPU path is right for small T; for long T use an MXU contraction plus a
    # T-tiled online-softmax grid axis (see TODO at top).
    context = jnp.sum(attn[:, :, None] * full, axis=1)                # (BB, D)

    if len(out_ref.shape) == 3:
        # Lane-dense slab write: (1, 1, BB*D), unmasked vst when BB*D % 128 == 0.
        out_ref[...] = _rows_to_lane_slab(context).reshape(1, 1, BB * D).astype(out_ref.dtype)
    else:
        # D is already a multiple of 128: rows are lane-dense as-is.
        out_ref[...] = context.astype(out_ref.dtype)


def attn_forward(full, last, w1, b1, w2, b2, v, bv, *, b_blk=None):
    """full: (B,T,D), last: (B,1,D), w1/w2: (D,H) (torch weight transposed),
    b1/b2: (H,), v: (1,H), bv: (1,)."""
    B, T, D = full.shape
    Dw, H = w1.shape
    assert Dw == D and w2.shape == (D, H), "W1/W2 must be (D, H)"
    # The PyTorch module only type-checks when output_shape == input_shape.
    assert H == D, "AttnLayer requires output_shape == input_shape (H == D)"

    if b_blk is None:
        # One grid step: v5e/v6e have a single TensorCore, and at small sizes
        # even v7x loses the 2-TC split to per-step overhead.  For large
        # batches on v7x pick b_blk = B // 2 (or smaller) so the "parallel"
        # grid axis spreads work across both TensorCores; re-derive tiles
        # against v7x's 64 MiB VMEM and raise vmem_limit_bytes if needed.
        b_blk = B
    assert B % b_blk == 0, "batch must be divisible by the batch block"

    w_cat = jnp.concatenate([w1, w2], axis=1)                 # (D, 2H) = [W1^T | W2^T]
    b_sum = (b1 + b2).reshape(1, H)                           # tanh sees b1 + b2 once
    bv2 = jnp.asarray(bv, jnp.float32).reshape(1, 1)

    if D % 128 == 0:
        out_shape = jax.ShapeDtypeStruct((B, D), jnp.float32)
        out_spec = pl.BlockSpec((b_blk, D), lambda b: (b, 0))
    else:
        # Lane-dense slab: one (1, 1, b_blk*D) row per grid step
        # (b_blk*D = 256 at the demo shapes -> unmasked stores).
        out_shape = jax.ShapeDtypeStruct((B // b_blk, 1, b_blk * D), jnp.float32)
        out_spec = pl.BlockSpec((1, 1, b_blk * D), lambda b: (b, 0, 0))

    # NOTE: weight/bias specs are grid-invariant; with multiple grid steps at
    # production sizes mark them pipeline_mode=pl.Buffered(1) (or copy them to
    # scratch once) to halve their VMEM footprint.  Irrelevant at grid=(1,).
    out = pl.pallas_call(
        _attn_kernel,
        out_shape=out_shape,
        grid_spec=pltpu.PrefetchScalarGridSpec(
            num_scalar_prefetch=0,
            grid=(B // b_blk,),
            in_specs=[
                pl.BlockSpec((b_blk, T, D), lambda b: (b, 0, 0)),    # full
                pl.BlockSpec((b_blk, 1, D), lambda b: (b, 0, 0)),    # last
                pl.BlockSpec((D, 2 * H), lambda b: (0, 0)),          # [W1^T | W2^T]
                pl.BlockSpec((1, H), lambda b: (0, 0)),              # b1 + b2
                pl.BlockSpec((1, H), lambda b: (0, 0)),              # V weight
                pl.BlockSpec(memory_space=pltpu.MemorySpace.SMEM),   # V bias (scalar)
            ],
            out_specs=out_spec,
        ),
        compiler_params=pltpu.CompilerParams(
            dimension_semantics=("parallel",)),
    )(full, last, w_cat, b_sum, v, bv2)
    return out.reshape(B, D)


def reference_forward(full, last, w1_t, b1, w2_t, b2, v_t, bv):
    """Pure-JAX reference mirroring the PyTorch module (torch weight layout)."""
    h = jnp.tanh((last @ w1_t.T + b1) + (full @ w2_t.T + b2))         # (B, T, H)
    scores = h @ v_t.T + bv                                           # (B, T, 1)
    attn = jax.nn.softmax(scores, axis=1)                             # dim=1, like torch
    return jnp.sum(attn * full, axis=1)                               # (B, D)


if __name__ == "__main__":
    # output_shape must equal input_shape for the module's V(.) to type-check.
    B, T, D = 8, 8, 32
    H = D

    key = jax.random.PRNGKey(0)
    kf, kl, k1, k2, k3, k4, k5, k6 = jax.random.split(key, 8)

    full = jax.random.normal(kf, (B, T, D), jnp.float32)
    last = jax.random.normal(kl, (B, 1, D), jnp.float32)

    # Parameters in torch nn.Linear layout: weight (out, in), bias (out,).
    w1_t = jax.random.uniform(k1, (H, D), jnp.float32, -0.2, 0.2)
    b1 = jax.random.uniform(k2, (H,), jnp.float32, -0.2, 0.2)
    w2_t = jax.random.uniform(k3, (H, D), jnp.float32, -0.2, 0.2)
    b2 = jax.random.uniform(k4, (H,), jnp.float32, -0.2, 0.2)
    v_t = jax.random.uniform(k5, (1, H), jnp.float32, -0.2, 0.2)
    bv = jax.random.uniform(k6, (1,), jnp.float32, -0.2, 0.2)

    out = attn_forward(full, last, w1_t.T, b1, w2_t.T, b2, v_t, bv)
    out = jax.block_until_ready(out)

    ref = reference_forward(full, last, w1_t, b1, w2_t, b2, v_t, bv)
    assert out.shape == (B, D)
    assert jnp.allclose(out, ref, atol=1e-2, rtol=1e-2), "mismatch vs JAX reference"

    print("KERNEL_OK")
</pallas_src>

<mosaic_0001>
module attributes {stable_mosaic.version = 11 : i64} {
  func.func @_attn_kernel(%arg0: i32, %arg1: memref<8x8x32xf32, #tpu.memory_space<vmem>>, %arg2: memref<8x1x32xf32, #tpu.memory_space<vmem>>, %arg3: memref<32x64xf32, #tpu.memory_space<vmem>>, %arg4: memref<1x32xf32, #tpu.memory_space<vmem>>, %arg5: memref<1x32xf32, #tpu.memory_space<vmem>>, %arg6: memref<1x1xf32, #tpu.memory_space<smem>>, %arg7: memref<1x1x256xf32, #tpu.memory_space<vmem>>) attributes {dimension_semantics = [#tpu.dimension_semantics<parallel>], iteration_bounds = array<i64: 1>, scalar_prefetch = 0 : i64, scratch_operands = 0 : i64, tpu.core_type = #tpu.core_type<tc>, window_params = [{transform_indices = @transform_0, window_bounds = array<i64: 8, 8, 32>}, {transform_indices = @transform_1, window_bounds = array<i64: 8, 1, 32>}, {pipeline_mode = #tpu.pipeline_mode<synchronous>, transform_indices = @transform_2, window_bounds = array<i64: 32, 64>}, {pipeline_mode = #tpu.pipeline_mode<synchronous>, transform_indices = @transform_3, window_bounds = array<i64: 1, 32>}, {pipeline_mode = #tpu.pipeline_mode<synchronous>, transform_indices = @transform_4, window_bounds = array<i64: 1, 32>}, {transform_indices = @transform_5, window_bounds = array<i64: 1, 1>}, {transform_indices = @transform_6, window_bounds = array<i64: 1, 1, 256>}]} {
    %c0 = arith.constant 0 : index
    %c0_0 = arith.constant 0 : index
    %c0_1 = arith.constant 0 : index
    %0 = vector.load %arg1[%c0, %c0_0, %c0_1] : memref<8x8x32xf32, #tpu.memory_space<vmem>>, vector<8x8x32xf32>
    %c0_2 = arith.constant 0 : index
    %c0_3 = arith.constant 0 : index
    %c0_4 = arith.constant 0 : index
    %1 = vector.load %arg2[%c0_2, %c0_3, %c0_4] : memref<8x1x32xf32, #tpu.memory_space<vmem>>, vector<8x1x32xf32>
    %2 = vector.shape_cast %1 : vector<8x1x32xf32> to vector<8x32xf32>
    %3 = vector.shape_cast %0 : vector<8x8x32xf32> to vector<64x32xf32>
    %4 = tpu.concatenate %2, %3 in 0 : vector<8x32xf32>, vector<64x32xf32> -> vector<72x32xf32>
    %c0_5 = arith.constant 0 : index
    %c0_6 = arith.constant 0 : index
    %5 = vector.load %arg3[%c0_5, %c0_6] : memref<32x64xf32, #tpu.memory_space<vmem>>, vector<32x64xf32>
    %cst = arith.constant dense<0.000000e+00> : vector<72x64xf32>
    %6 = tpu.matmul %4, %5, %cst {dimension_numbers = #tpu.dot_dimension_numbers<[1], [0], [0], [1], [0, 0, 1, 1], [], []>} : vector<72x32xf32>, vector<32x64xf32>, vector<72x64xf32> -> vector<72x64xf32>
    %7 = vector.extract_strided_slice %6 {offsets = [0, 0], sizes = [8, 32], strides = [1, 1]} : vector<72x64xf32> to vector<8x32xf32>
    %8 = vector.extract_strided_slice %6 {offsets = [8, 32], sizes = [64, 32], strides = [1, 1]} : vector<72x64xf32> to vector<64x32xf32>
    %9 = vector.shape_cast %8 : vector<64x32xf32> to vector<8x8x32xf32>
    %10 = vector.shape_cast %7 : vector<8x32xf32> to vector<8x1x32xf32>
    %11 = vector.broadcast %10 : vector<8x1x32xf32> to vector<8x8x32xf32>
    %12 = arith.addf %11, %9 : vector<8x8x32xf32>
    %c0_7 = arith.constant 0 : index
    %c0_8 = arith.constant 0 : index
    %13 = vector.load %arg4[%c0_7, %c0_8] : memref<1x32xf32, #tpu.memory_space<vmem>>, vector<1x32xf32>
    %14 = vector.shape_cast %13 : vector<1x32xf32> to vector<1x1x32xf32>
    %15 = vector.broadcast %14 : vector<1x1x32xf32> to vector<8x8x32xf32>
    %16 = arith.addf %12, %15 : vector<8x8x32xf32>
    %17 = math.tanh %16 : vector<8x8x32xf32>
    %c0_9 = arith.constant 0 : index
    %c0_10 = arith.constant 0 : index
    %18 = vector.load %arg5[%c0_9, %c0_10] : memref<1x32xf32, #tpu.memory_space<vmem>>, vector<1x32xf32>
    %19 = vector.shape_cast %18 : vector<1x32xf32> to vector<1x1x32xf32>
    %20 = vector.broadcast %19 : vector<1x1x32xf32> to vector<8x8x32xf32>
    %21 = arith.mulf %17, %20 : vector<8x8x32xf32>
    %cst_11 = arith.constant dense<0.000000e+00> : vector<8x8xf32>
    %22 = vector.multi_reduction <add>, %21, %cst_11 [2] : vector<8x8x32xf32> to vector<8x8xf32>
    %c0_12 = arith.constant 0 : index
    %c0_13 = arith.constant 0 : index
    %23 = memref.load %arg6[%c0_12, %c0_13] : memref<1x1xf32, #tpu.memory_space<smem>>
    %24 = vector.broadcast %23 : f32 to vector<8x8xf32>
    %25 = arith.addf %22, %24 : vector<8x8xf32>
    %cst_14 = arith.constant dense<0xFF800000> : vector<8xf32>
    %26 = vector.multi_reduction <maximumf>, %25, %cst_14 [1] : vector<8x8xf32> to vector<8xf32>
    %27 = vector.shape_cast %26 : vector<8xf32> to vector<8x1xf32>
    %28 = vector.broadcast %27 : vector<8x1xf32> to vector<8x8xf32>
    %29 = arith.subf %25, %28 : vector<8x8xf32>
    %30 = math.exp %29 : vector<8x8xf32>
    %cst_15 = arith.constant dense<0.000000e+00> : vector<8xf32>
    %31 = vector.multi_reduction <add>, %30, %cst_15 [1] : vector<8x8xf32> to vector<8xf32>
    %32 = vector.shape_cast %31 : vector<8xf32> to vector<8x1xf32>
    %33 = vector.broadcast %32 : vector<8x1xf32> to vector<8x8xf32>
    %34 = arith.divf %30, %33 : vector<8x8xf32>
    %35 = vector.shape_cast %34 : vector<8x8xf32> to vector<8x8x1xf32>
    %36 = vector.broadcast %35 : vector<8x8x1xf32> to vector<8x8x32xf32>
    %37 = arith.mulf %36, %0 : vector<8x8x32xf32>
    %cst_16 = arith.constant dense<0.000000e+00> : vector<8x32xf32>
    %38 = vector.multi_reduction <add>, %37, %cst_16 [1] : vector<8x8x32xf32> to vector<8x32xf32>
    %39 = tpu.iota {dimensions = array<i32: 1>} : vector<32x256xi32>
    %40 = tpu.iota {dimensions = array<i32: 0>} : vector<32x256xi32>
    %c31_i32 = arith.constant 31 : i32
    %41 = vector.broadcast %c31_i32 : i32 to vector<32x256xi32>
    %42 = arith.andi %39, %41 : vector<32x256xi32>
    %43 = arith.cmpi eq, %42, %40 : vector<32x256xi32>
    %44 = arith.extui %43 : vector<32x256xi1> to vector<32x256xi32>
    %45 = arith.sitofp %44 : vector<32x256xi32> to vector<32x256xf32>
    %cst_17 = arith.constant dense<0.000000e+00> : vector<8x256xf32>
    %46 = tpu.matmul %38, %45, %cst_17 {dimension_numbers = #tpu.dot_dimension_numbers<[1], [0], [0], [1], [0, 0, 1, 1], [], []>} : vector<8x32xf32>, vector<32x256xf32>, vector<8x256xf32> -> vector<8x256xf32>
    %47 = tpu.iota {dimensions = array<i32: 0>} : vector<8x256xi32>
    %48 = tpu.iota {dimensions = array<i32: 1>} : vector<8x256xi32>
    %c32_i32 = arith.constant 32 : i32
    %49 = vector.broadcast %c32_i32 : i32 to vector<8x256xi32>
    %50 = arith.muli %47, %49 : vector<8x256xi32>
    %51 = arith.cmpi sge, %48, %50 : vector<8x256xi32>
    %c1_i32 = arith.constant 1 : i32
    %52 = vector.broadcast %c1_i32 : i32 to vector<8x256xi32>
    %53 = arith.addi %47, %52 : vector<8x256xi32>
    %c32_i32_18 = arith.constant 32 : i32
    %54 = vector.broadcast %c32_i32_18 : i32 to vector<8x256xi32>
    %55 = arith.muli %53, %54 : vector<8x256xi32>
    %56 = arith.cmpi slt, %48, %55 : vector<8x256xi32>
    %57 = arith.andi %51, %56 : vector<8x256xi1>
    %cst_19 = arith.constant 0.000000e+00 : f32
    %58 = vector.broadcast %cst_19 : f32 to vector<8x256xf32>
    %59 = arith.select %57, %46, %58 : vector<8x256xi1>, vector<8x256xf32>
    %cst_20 = arith.constant dense<0.000000e+00> : vector<256xf32>
    %60 = vector.multi_reduction <add>, %59, %cst_20 [0] : vector<8x256xf32> to vector<256xf32>
    %61 = vector.shape_cast %60 : vector<256xf32> to vector<1x256xf32>
    %62 = vector.shape_cast %61 : vector<1x256xf32> to vector<1x1x256xf32>
    %c0_21 = arith.constant 0 : index
    %c0_22 = arith.constant 0 : index
    %c0_23 = arith.constant 0 : index
    %63 = vector.load %arg7[%c0_21, %c0_22, %c0_23] : memref<1x1x256xf32, #tpu.memory_space<vmem>>, vector<1x1x256xf32>
    tpu.vector_store %arg7[%c0_21, %c0_22, %c0_23], %62 {strides = array<i32>} : memref<1x1x256xf32, #tpu.memory_space<vmem>>, vector<1x1x256xf32>,
    return
  }
  func.func @transform_0(%arg0: i32) -> (i32, i32, i32) {
    %c0_i32 = arith.constant 0 : i32
    %c0_i32_0 = arith.constant 0 : i32
    %c0_i32_1 = arith.constant 0 : i32
    return %arg0, %c0_i32, %c0_i32_0 : i32, i32, i32
  }
  func.func @transform_1(%arg0: i32) -> (i32, i32, i32) {
    %c0_i32 = arith.constant 0 : i32
    %c0_i32_0 = arith.constant 0 : i32
    %c0_i32_1 = arith.constant 0 : i32
    return %arg0, %c0_i32, %c0_i32_0 : i32, i32, i32
  }
  func.func @transform_2(%arg0: i32) -> (i32, i32) {
    %c0_i32 = arith.constant 0 : i32
    %c0_i32_0 = arith.constant 0 : i32
    %c0_i32_1 = arith.constant 0 : i32
    return %c0_i32, %c0_i32_0 : i32, i32
  }
  func.func @transform_3(%arg0: i32) -> (i32, i32) {
    %c0_i32 = arith.constant 0 : i32
    %c0_i32_0 = arith.constant 0 : i32
    %c0_i32_1 = arith.constant 0 : i32
    return %c0_i32, %c0_i32_0 : i32, i32
  }
  func.func @transform_4(%arg0: i32) -> (i32, i32) {
    %c0_i32 = arith.constant 0 : i32
    %c0_i32_0 = arith.constant 0 : i32
    %c0_i32_1 = arith.constant 0 : i32
    return %c0_i32, %c0_i32_0 : i32, i32
  }
  func.func @transform_5(%arg0: i32) -> (i32, i32) {
    %c0_i32 = arith.constant 0 : i32
    %c0_i32_0 = arith.constant 0 : i32
    %c0_i32_1 = arith.constant 0 : i32
    return %c0_i32, %c0_i32_0 : i32, i32
  }
  func.func @transform_6(%arg0: i32) -> (i32, i32, i32) {
    %c0_i32 = arith.constant 0 : i32
    %c0_i32_0 = arith.constant 0 : i32
    %c0_i32_1 = arith.constant 0 : i32
    return %arg0, %c0_i32, %c0_i32_0 : i32, i32, i32
  }
}

</mosaic_0001>

<bundles_post_ra>
// kernel: tpu_custom_call.1
= control target key start
LH: loop header
LB: loop body
LE: loop exit
PB: predicated region body
PF: predicated region fallthrough
CT: control target
= control target key end

     0   :  { %12 = vsyncpa [#allocation4], 0  ;;  %s1630_s0 = inlined_call_operand.hbm [shape: f32[8,8,32], index: 0, kind: input, shape index: {}]   ;;  %s1631_s1 = inlined_call_operand.hbm [shape: f32[8,1,32], index: 1, kind: input, shape index: {}]   ;;  %s1632_s2 = inlined_call_operand.hbm [shape: f32[32,64], index: 2, kind: input, shape index: {}]   ;;  %s1633_s3 = inlined_call_operand.vmem [shape: f32[1,32], index: 3, kind: input, shape index: {}]   ;;  %s1634_s4 = inlined_call_operand.vmem [shape: f32[1,32], index: 4, kind: input, shape index: {}]   ;;  %s1635_s5 = inlined_call_operand.<no memory space> [shape: f32[1,1], index: 5, kind: input, shape index: {}]   ;;  %s1636_s6 = inlined_call_operand.hbm [shape: f32[1,1,256], index: 6, kind: output, shape index: {}]  }
   0x1   :  { %13 = vsyncpa [#allocation7], 0 }
   0x2   :  { %14 = vsyncpa [#allocation5], 0  ;;  %s1279_s21 = smov [#allocation6]   ;;  %s1185_s25 = scalar_lea.hbm %s1631_s1, 128 }
   0x3   :  { %s32_s22 = sshll.u32 %s1279_s21, 4  ;;  %p1186_p0 = scmp.ne.s32.totalorder %s1631_s1, %s1185_s25  ;;  %s33_s22 = int_to_ptr.vmem [resolvable:$true] %s32_s22 }
   0x4   :  { %p1189_p1 = scmp.lt.u32.totalorder %s1185_s25, %s1631_s1 }
   0x6   :  { %p1191_p2 = pnand %p1189_p1, %p1186_p0 }
   0x8   :  { %1194 = shalt.err (!%p1191_p2)
}
   0x9   :  { %s1195_s30 = scalar_lea.vmem %s33_s22, 128  ;;  %p1200_p4 = scmp.lt.s32.totalorder %s33_s22, %s33_s22 }
   0xa   :  { %p1196_p3 = scmp.ne.s32.totalorder %s33_s22, %s1195_s30  ;;  %p1201_p5 = scmp.lt.s32.totalorder %s1195_s30, %s1195_s30 }
   0xc   :  { %p1202_p6 = por %p1201_p5, %p1200_p4 }
   0xe   :  { %p1203_p7 = pnand %p1202_p6, %p1196_p3 }
  0x10   :  { %1206 = shalt.err (!%p1203_p7)
}
  0x11   :  { %s1280_s7 = smov 16   ;;  %s1281_s8 = smov 1  }
  0x12   :  { %38 = dma.hbm_to_vmem [thread:$0]  %s1631_s1, 128, %s33_s22, [#allocation7], %s1280_s7, %s1280_s7, %s1281_s8  }
  0x13   :  { %s1282_s11 = smov [#allocation3]   ;;  %s1207_s15 = scalar_lea.hbm %s1630_s0, 1024 }
  0x14   :  { %s20_s12 = sshll.u32 %s1282_s11, 4  ;;  %p1208_p8 = scmp.ne.s32.totalorder %s1630_s0, %s1207_s15  ;;  %s21_s12 = int_to_ptr.vmem [resolvable:$true] %s20_s12 }
  0x15   :  { %p1211_p9 = scmp.lt.u32.totalorder %s1207_s15, %s1630_s0 }
  0x17   :  { %p1213_p10 = pnand %p1211_p9, %p1208_p8 }
  0x19   :  { %1216 = shalt.err (!%p1213_p10)
}
  0x1a   :  { %s1217_s20 = scalar_lea.vmem %s21_s12, 1024  ;;  %p1222_p12 = scmp.lt.s32.totalorder %s21_s12, %s21_s12 }
  0x1b   :  { %p1218_p11 = scmp.ne.s32.totalorder %s21_s12, %s1217_s20  ;;  %p1223_p13 = scmp.lt.s32.totalorder %s1217_s20, %s1217_s20 }
  0x1d   :  { %p1224_p0 = por %p1223_p13, %p1222_p12 }
  0x1f   :  { %p1225_p1 = pnand %p1224_p0, %p1218_p11 }
  0x21   :  { %1228 = shalt.err (!%p1225_p1)
}
  0x22   :  { %s1283_s1 = smov 128   ;;  %s1284_s21 = smov 8  }
  0x23   :  { %26 = dma.hbm_to_vmem [thread:$0]  %s1630_s0, 1024, %s21_s12, [#allocation4], %s1283_s1, %s1283_s1, %s1284_s21  }
  0x24   :  { %s1285_s24 = smov [#allocation8]   ;;  %s1229_s28 = scalar_lea.hbm %s1632_s2, 512 }
  0x25   :  { %s44_s25 = sshll.u32 %s1285_s24, 4  ;;  %p1230_p2 = scmp.ne.s32.totalorder %s1632_s2, %s1229_s28  ;;  %s45_s25 = int_to_ptr.vmem [resolvable:$true] %s44_s25 }
  0x26   :  { %p1233_p3 = scmp.lt.u32.totalorder %s1229_s28, %s1632_s2 }
  0x28   :  { %p1235_p4 = pnand %p1233_p3, %p1230_p2 }
  0x2a   :  { %1238 = shalt.err (!%p1235_p4)
}
  0x2b   :  { %s1239_s9 = scalar_lea.vmem %s45_s25, 512  ;;  %p1244_p6 = scmp.lt.s32.totalorder %s45_s25, %s45_s25 }
  0x2c   :  { %p1240_p5 = scmp.ne.s32.totalorder %s45_s25, %s1239_s9  ;;  %p1245_p7 = scmp.lt.s32.totalorder %s1239_s9, %s1239_s9 }
  0x2e   :  { %p1246_p8 = por %p1245_p7, %p1244_p6 }
  0x30   :  { %p1247_p9 = pnand %p1246_p8, %p1240_p5 }
  0x32   :  { %1250 = shalt.err (!%p1247_p9)
}
  0x33   :  { %50 = dma.hbm_to_vmem [thread:$0]  %s1632_s2, 512, %s45_s25, [#allocation7], %s1283_s1, %s1283_s1, %s1284_s21  }
  0x34   :  { %1273 = dma.done.wait [#allocation4], 1024  }
  0x35   :  { %1274 = vsyncadd [#allocation4], 4294966272 }
  0x36   :  { %1275 = dma.done.wait [#allocation7], 640  }
  0x37   :  { %1276 = vsyncadd [#allocation7], 4294966656  ;;  %v1286_v0 = vmov 0.0|0.0   ;;  %v97_v1 = vlaneseq  ;;  %vm1287_vm0 = vmmov 0   ;;  %v1288_v2 = vmov 0.0   ;;  %v139_v7 = vld [vmem:[#allocation8] sm:$0xff] }
  0x38   :  { %1116 = vmatprep.subr.bf16.mxu1 %v1286_v0  ;;  %1102 = vmatprep.subr.bf16.mxu0 %v1286_v0  ;;  %v1289_v3 = vmov 1966171168   ;;  %v140_v8 = vld [vmem:[#allocation8 + $0x8] sm:$0xff]  ;;  %v141_v9 = vld [vmem:[#allocation8 + $0x10] sm:$0xff]  ;;  %v142_v11 = vld [vmem:[#allocation8 + $0x18] sm:$0xff]  ;;  %vm143_vm1 = vcmask 261120  }
  0x39   :  { %1090 = vmatprep.mubr.msk.f32.mxu1 %vm1287_vm0, %v1288_v2  ;;  %1075 = vmatprep.mubr.msk.f32.mxu0 %vm1287_vm0, %v1288_v2  ;;  %v95_v4 = vunpack.c.l.s4 %v1289_v3  ;;  %v1370_v6 = vshrl.u32 %v97_v1, 7  ;;  %v1103_v10 = vpack.c.bf16 %v140_v8, %v139_v7  ;;  %v74_v12 = vld [vmem:[#allocation6] sm:$0x1]  ;;  %v75_v14 = vld [vmem:[#allocation6 + $0x1] sm:$0x1]  ;;  %v1106_v17 = vpack.c.bf16 %v142_v11, %v141_v9  ;;  %v1387_v35 = vld [vmem:[#allocation3 + $0x28] sm:$0xff] }
  0x3a   :  { %v76_v15 = vld [vmem:[#allocation6 + $0x2] sm:$0x1]  ;;  %v77_v16 = vld [vmem:[#allocation6 + $0x3] sm:$0x1]  ;;  %v78_v18 = vld [vmem:[#allocation6 + $0x4] sm:$0x1]  ;;  %v90_v21 = vcombine.low %v74_v12, %v75_v14 }
  0x3b   :  { %v96_v5 = vunpack.c.0.s8 %v95_v4  ;;  %1118 = vmatpush3.bf16.msra.mxu1 %v1103_v10  ;;  %1104 = vmatpush3.bf16.msra.mxu0 %v1103_v10  ;;  %v79_v19 = vld [vmem:[#allocation6 + $0x5] sm:$0x1]  ;;  %v80_v20 = vld [vmem:[#allocation6 + $0x6] sm:$0x1]  ;;  %v91_v22 = vcombine.low %v76_v15, %v77_v16  ;;  %v81_v23 = vld [vmem:[#allocation6 + $0x7] sm:$0x1] }
  0x3c   :  { %1117 = vmatprep.subr.bf16.mxu1 %v1286_v0  ;;  %1105 = vmatprep.subr.bf16.mxu0 %v1286_v0  ;;  %v92_v24 = vcombine.low %v78_v18, %v79_v19  ;;  %v93_v25 = vcombine.low %v80_v20, %v81_v23  ;;  %v1378_v29 = vld [vmem:[#allocation3 + $0x20] sm:$0xff]  ;;  %v1394_v37 = vld [vmem:[#allocation3 + $0x30] sm:$0xff]  ;;  %v1406_v39 = vld [vmem:[#allocation3 + $0x38] sm:$0xff]  ;;  %s1290_s2 = smov 96   ;;  %v1433_v3 = vsub.s32 0, %v1370_v6  ;;  %vm524_vm2 = vcmask 1041409  }
  0x3d   :  { %v1373_v13 = vsub.s32 %v96_v5, %v1370_v6  ;;  %v1398_v38 = vld [vmem:[#allocation3] sm:$0xff]  ;;  %v1410_v40 = vld [vmem:[#allocation3 + $0x8] sm:$0xff]  ;;  %v1419_v41 = vld [vmem:[#allocation3 + $0x10] sm:$0xff]  ;;  %vm526_vm3 = vcmask 1042434   ;;  %vm528_vm4 = vcmask 1043459   ;;  %vm1640_vm5 = vcmask 1044484  }
  0x3e   :  { %v1425_v42 = vld [vmem:[#allocation3 + $0x18] sm:$0xff]  ;;  %v1035_v10 = vld [vmem:[%s1633_s3] ss:$0 sm:$0xff]  ;;  %vm1639_vm6 = vcmask 1045509   ;;  %vm1638_vm7 = vcmask 1046534   ;;  %vm1637_vm8 = vcmask 1047559  }
  0x3f   :  { %v100_v26 = vrot.slane %v90_v21, %v1373_v13  ;;  %v107_v27 = vrot.slane %v91_v22, %v1373_v13  ;;  %v114_v28 = vrot.slane %v92_v24, %v1373_v13  ;;  %1119 = vmatpush3.bf16.msra.mxu1 %v1106_v17  ;;  %1107 = vmatpush3.bf16.msra.mxu0 %v1106_v17  ;;  %vm539_vm9 = vcmask 64512  }
  0x40   :  { %v121_v30 = vrot.slane %v93_v25, %v1373_v13 }
  0x41   :  { %v122_v31 = vcombine.low %v100_v26, %v107_v27 }
  0x42   :  { %v123_v32 = vcombine.low %v114_v28, %v121_v30  ;;  %1091 = vmatmul.mubr.msk.f32.vlgmr.msra.gmra.mrb[0].mxu1 %vm143_vm1, %v1378_v29 }
  0x43   :  { %v130_v33 = vrot.slane %v122_v31, %v1373_v13  ;;  %1093 = vmatprep.mubr.msk.f32.mxu1 %vm1287_vm0, %v1288_v2 }
  0x44   :  { %v137_v34 = vrot.slane %v123_v32, %v1373_v13 }
  0x46   :  { %v138_v36 = vcombine.low %v130_v33, %v137_v34  ;;  %1094 = vmatmul.mubr.msk.f32.gmra.mrb[2].mxu1 %vm143_vm1, %v1387_v35 }
  0x47   :  { %1096 = vmatprep.mubr.msk.f32.mxu1 %vm1287_vm0, %v1288_v2 }
  0x48   :  { %1076 = vmatmul.mubr.msk.f32.vlgmr.msra.gmra.mrb[0].mxu0 %vm143_vm1, %v138_v36 }
  0x49   :  { %1078 = vmatprep.mubr.msk.f32.mxu0 %vm1287_vm0, %v1288_v2 }
  0x4a   :  { %1097 = vmatmul.mubr.msk.f32.gmra.mrb[4].mxu1 %vm143_vm1, %v1394_v37 }
  0x4b   :  { %1099 = vmatprep.mubr.msk.f32.mxu1 %vm1287_vm0, %v1288_v2 }
  0x4c   :  { %1079 = vmatmul.mubr.msk.f32.gmra.mrb[2].mxu0 %vm143_vm1, %v1398_v38 }
  0x4d   :  { %1081 = vmatprep.mubr.msk.f32.mxu0 %vm1287_vm0, %v1288_v2 }
  0x4e   :  { %1100 = vmatmul.mubr.msk.f32.gmra.mrb[6].mxu1 %vm143_vm1, %v1406_v39 }
  0x4f   :  { %957 = vmatprep.mubr.f32.mxu1 %v1288_v2 }
  0x50   :  { %1082 = vmatmul.mubr.msk.f32.gmra.mrb[4].mxu0 %vm143_vm1, %v1410_v40 }
  0x51   :  { %1084 = vmatprep.mubr.msk.f32.mxu0 %vm1287_vm0, %v1288_v2 }
  0x54   :  { %1085 = vmatmul.mubr.msk.f32.gmra.mrb[6].mxu0 %vm143_vm1, %v1419_v41 }
  0x55   :  { %1087 = vmatprep.mubr.msk.f32.mxu0 %vm1287_vm0, %v1288_v2 }
  0x58   :  { %1088 = vmatmul.mubr.msk.f32.gmra.mrb[8].mxu0 %vm143_vm1, %v1425_v42 }
 0x115   :  { %v261_v43 = vpop.f32.mrb[0].mxu1 }
 0x116   :  { %v1092_v44 = vpop.f32.mrb[1].mxu1 }
 0x119   :  { %v266_v45 = vpop.f32.mrb[2].mxu1 }
 0x11a   :  { %388 = vrot.lane.b32.xlu1 %v266_v45, %s1290_s2  ;;  %v1095_v47 = vpop.f32.mrb[3].mxu1 }
 0x11b   :  { %v236_v46 = vpop.f32.mrb[0].mxu0 }
 0x11c   :  { %v1077_v48 = vpop.f32.mrb[1].mxu0  ;;  %v281_v61 = vcombine.high %v236_v46, %v236_v46  ;;  %v288_v2 = vrot.slane %v236_v46, %v1373_v13 }
 0x11d   :  { %v271_v49 = vpop.f32.mrb[4].mxu1 }
 0x11e   :  { %v1098_v51 = vpop.f32.mrb[5].mxu1  ;;  %v295_v62 = vrot.slane %v281_v61, %v1373_v13  ;;  %v296_v5 = vcombine.high %v288_v2, %v288_v2  ;;  %v304_v7 = vrot.slane %v288_v2, %v1373_v13 }
 0x11f   :  { %v241_v50 = vpop.f32.mrb[2].mxu0 }
 0x120   :  { %378 = vrot.lane.b32.xlu0 %v241_v50, %s1290_s2  ;;  %v1080_v52 = vpop.f32.mrb[3].mxu0  ;;  %v297_v63 = vcombine.high %v295_v62, %v295_v62  ;;  %v333_v11 = vrot.slane %v304_v7, %v1433_v3  ;;  %v318_v12 = vrot.slane %v296_v5, %v1373_v13  ;;  %v311_v17 = vrot.slane %v295_v62, %v1373_v13 }
 0x121   :  { %v276_v53 = vpop.f32.mrb[6].mxu1  ;;  %v326_v20 = vcombine.high %v304_v7, %v304_v7 }
 0x122   :  { %v1101_v55 = vpop.f32.mrb[7].mxu1  ;;  %v325_v0 = vrot.slane %v297_v63, %v1373_v13  ;;  %v337_v19 = vrot.slane %v318_v12, %v1433_v3  ;;  %v327_v23 = vcombine.high %v311_v17, %v311_v17  ;;  %v349_v25 = vrot.slane %v311_v17, %v1433_v3 }
 0x123   :  { %v246_v54 = vpop.f32.mrb[4].mxu0  ;;  %v341_v26 = vrot.slane %v326_v20, %v1433_v3  ;;  %v328_v27 = vcombine.high %v318_v12, %v318_v12 }
 0x124   :  { %380 = vrot.lane.b32.xlu0 %v246_v54, %s1290_s2  ;;  %v1083_v56 = vpop.f32.mrb[5].mxu0  ;;  %v353_v4 = vrot.slane %v325_v0, %v1433_v3  ;;  %v357_v33 = vrot.slane %v327_v23, %v1433_v3  ;;  %v329_v44 = vcombine.high %v325_v0, %v325_v0  ;;  %v1461_v23 = vand.u32 127, %v97_v1 }
 0x126   :  { %v361_v54 = vrot.slane %v329_v44, %v1433_v3 }
 0x127   :  { %v251_v57 = vpop.f32.mrb[6].mxu0 }
 0x128   :  { %386 = vrot.lane.b32.xlu0 %v261_v43, %s1290_s2  ;;  %382 = vrot.lane.b32.xlu1 %v251_v57, %s1290_s2  ;;  %v1086_v58 = vpop.f32.mrb[7].mxu0  ;;  %v345_v43 = vrot.slane %v328_v27, %v1433_v3 }
 0x12b   :  { %v256_v59 = vpop.f32.mrb[8].mxu0 }
 0x12c   :  { %390 = vrot.lane.b32.xlu0 %v271_v49, %s1290_s2  ;;  %384 = vrot.lane.b32.xlu1 %v256_v59, %s1290_s2  ;;  %v1089_v60 = vpop.f32.mrb[9].mxu0  ;;  %v1036_v49 = vld [vmem:[%s1634_s4] ss:$0 sm:$0xff] }
 0x130   :  { %392 = vrot.lane.b32.xlu1 %v276_v53, %s1290_s2 }
 0x18c   :  { %v389_v8 = vpop.permute.xlu1 %388 }
 0x18d   :  { %v407_v9 = vadd.f32 %v389_v8, %v353_v4 }
 0x18f   :  { %v422_v14 = vadd.f32 %v1035_v10, %v407_v9 }
 0x191   :  { %1137 = vtanh.f32 %v422_v14 }
 0x192   :  { %v379_v15 = vpop.permute.xlu0 %378 }
 0x193   :  { %v402_v16 = vadd.f32 %v379_v15, %v333_v11 }
 0x195   :  { %v417_v18 = vadd.f32 %v1035_v10, %v402_v16 }
 0x196   :  { %v381_v21 = vpop.permute.xlu0 %380 }
 0x197   :  { %1139 = vtanh.f32 %v417_v18  ;;  %v403_v22 = vadd.f32 %v381_v21, %v337_v19 }
 0x199   :  { %v418_v24 = vadd.f32 %v1035_v10, %v403_v22 }
 0x19a   :  { %v387_v28 = vpop.permute.xlu0 %386  ;;  %v383_v30 = vpop.permute.xlu1 %382 }
 0x19b   :  { %1141 = vtanh.f32 %v418_v24  ;;  %v406_v31 = vadd.f32 %v387_v28, %v349_v25  ;;  %v404_v32 = vadd.f32 %v383_v30, %v341_v26  ;;  %v1138_v50 = vpop.eup %1137  ;;  %v473_v24 = vstv %s1635_s5  ;;  %s1293_s5 = smov [#allocation9]  }
 0x19c   :  { %v445_v59 = vmul.f32 %v1138_v50, %v1036_v49  ;;  %v1468_v28 = vsub.s32 %v1461_v23, %v1370_v6  ;;  %s1016_s15 = sshll.u32 %s1293_s5, 4  ;;  %s1017_s15 = int_to_ptr.vmem [resolvable:$true] %s1016_s15 }
 0x19d   :  { %v421_v34 = vadd.f32 %v1035_v10, %v406_v31  ;;  %v419_v36 = vadd.f32 %v1035_v10, %v404_v32  ;;  %s1251_s16 = scalar_lea.vmem %s1017_s15, 32  ;;  %p1256_p11 = scmp.lt.s32.totalorder %s1017_s15, %s1017_s15 }
 0x19e   :  { %v391_v45 = vpop.permute.xlu0 %390  ;;  %v385_v46 = vpop.permute.xlu1 %384  ;;  %v463_v63 = vsel %vm143_vm1, %v445_v59, 0.0  ;;  %p1252_p10 = scmp.ne.s32.totalorder %s1017_s15, %s1251_s16  ;;  %p1257_p12 = scmp.lt.s32.totalorder %s1251_s16, %s1251_s16 }
 0x19f   :  { %1143 = vtanh.f32 %v421_v34  ;;  %v408_v47 = vadd.f32 %v391_v45, %v357_v33  ;;  %v405_v48 = vadd.f32 %v385_v46, %v345_v43 }
 0x1a0   :  { %1145 = vtanh.f32 %v419_v36  ;;  %p1258_p13 = por %p1257_p12, %p1256_p11 }
 0x1a1   :  { %v1140_v51 = vpop.eup %1139  ;;  %v423_v52 = vadd.f32 %v1035_v10, %v408_v47  ;;  %v420_v53 = vadd.f32 %v1035_v10, %v405_v48 }
 0x1a2   :  { %v393_v55 = vpop.permute.xlu1 %392  ;;  %v440_v56 = vmul.f32 %v1140_v51, %v1036_v49  ;;  %p1259_p0 = pnand %p1258_p13, %p1252_p10 }
 0x1a3   :  { %1147 = vtanh.f32 %v423_v52  ;;  %v409_v57 = vadd.f32 %v393_v55, %v361_v54 }
 0x1a4   :  { %1149 = vtanh.f32 %v420_v53  ;;  %v448_v58 = vsel %vm143_vm1, %v440_v56, 0.0 }
 0x1a5   :  { %v1142_v60 = vpop.eup %1141  ;;  %v424_v61 = vadd.f32 %v1035_v10, %v409_v57  ;;  %449 = vadd.xlane.f32.xlu0 %v448_v58 }
 0x1a6   :  { %v441_v62 = vmul.f32 %v1142_v60, %v1036_v49 }
 0x1a7   :  { %1151 = vtanh.f32 %v424_v61 }
 0x1a8   :  { %v451_v0 = vsel %vm143_vm1, %v441_v62, 0.0 }
 0x1a9   :  { %v1144_v2 = vpop.eup %1143  ;;  %464 = vadd.xlane.f32.xlu0 %v463_v63  ;;  %452 = vadd.xlane.f32.xlu1 %v451_v0  ;;  %v1291_v63 = vmov 0   ;;  %v550_v0 = vsub.s32 1, %v1370_v6 }
 0x1aa   :  { %v1146_v4 = vpop.eup %1145  ;;  %v444_v5 = vmul.f32 %v1144_v2, %v1036_v49  ;;  %1136 = vset.pattern.permute.xlu1 %v1291_v63  ;;  %1135 = vset.pattern.permute.xlu0 %v1291_v63  ;;  %v554_v2 = vsub.s32 2, %v1370_v6 }
 0x1ab   :  { %v442_v7 = vmul.f32 %v1146_v4, %v1036_v49  ;;  %v558_v4 = vsub.s32 3, %v1370_v6 }
 0x1ac   :  { %v460_v8 = vsel %vm143_vm1, %v444_v5, 0.0 }
 0x1ad   :  { %v1148_v9 = vpop.eup %1147  ;;  %v454_v11 = vsel %vm143_vm1, %v442_v7, 0.0  ;;  %461 = vadd.xlane.f32.xlu1 %v460_v8 }
 0x1ae   :  { %v1150_v10 = vpop.eup %1149  ;;  %455 = vadd.xlane.f32.xlu0 %v454_v11  ;;  %v446_v12 = vmul.f32 %v1148_v9, %v1036_v49 }
 0x1af   :  { %v443_v14 = vmul.f32 %v1150_v10, %v1036_v49 }
 0x1b0   :  { %v466_v15 = vsel %vm143_vm1, %v446_v12, 0.0  ;;  %v562_v12 = vsub.s32 4, %v1370_v6 }
 0x1b1   :  { %v1152_v16 = vpop.eup %1151  ;;  %467 = vadd.xlane.f32.xlu1 %v466_v15  ;;  %v457_v17 = vsel %vm143_vm1, %v443_v14, 0.0 }
 0x1b2   :  { %458 = vadd.xlane.f32.xlu0 %v457_v17  ;;  %v447_v18 = vmul.f32 %v1152_v16, %v1036_v49 }
 0x1b4   :  { %v469_v19 = vsel %vm143_vm1, %v447_v18, 0.0  ;;  %v566_v18 = vsub.s32 5, %v1370_v6 }
 0x1b6   :  { %470 = vadd.xlane.f32.xlu0 %v469_v19 }
 0x232   :  { %v450_v20 = vpop.xlane.xlu0 %449 }
 0x233   :  { %v474_v30 = vadd.f32 %v473_v24, %v450_v20 }
 0x235   :  { %v495_v44 = vrot.slane %v474_v30, %v1468_v28 }
 0x236   :  { %v465_v21 = vpop.xlane.xlu0 %464  ;;  %v453_v22 = vpop.xlane.xlu1 %452 }
 0x237   :  { %v475_v25 = vadd.f32 %v473_v24, %v453_v22  ;;  %v1473_v45 = vadd.f32 %v473_v24, %v465_v21  ;;  %v570_v22 = vsub.s32 6, %v1370_v6 }
 0x239   :  { %v499_v32 = vrot.slane %v475_v25, %v1468_v28  ;;  %v515_v53 = vrot.slane %v1473_v45, %v1468_v28 }
 0x23a   :  { %v462_v26 = vpop.xlane.xlu1 %461 }
 0x23b   :  { %v456_v27 = vpop.xlane.xlu0 %455  ;;  %v478_v36 = vadd.f32 %v473_v24, %v462_v26  ;;  %v525_v48 = vsel %vm524_vm2, %v499_v32, %v495_v44 }
 0x23c   :  { %v476_v31 = vadd.f32 %v473_v24, %v456_v27  ;;  %v574_v27 = vsub.s32 7, %v1370_v6 }
 0x23d   :  { %v511_v51 = vrot.slane %v478_v36, %v1468_v28 }
 0x23e   :  { %v468_v33 = vpop.xlane.xlu1 %467  ;;  %v503_v34 = vrot.slane %v476_v31, %v1468_v28 }
 0x23f   :  { %v459_v43 = vpop.xlane.xlu0 %458  ;;  %v1475_v47 = vadd.f32 %v473_v24, %v468_v33 }
 0x240   :  { %v477_v46 = vadd.f32 %v473_v24, %v459_v43  ;;  %v527_v50 = vsel %vm526_vm3, %v503_v34, %v525_v48 }
 0x241   :  { %v519_v56 = vrot.slane %v1475_v47, %v1468_v28 }
 0x242   :  { %v507_v49 = vrot.slane %v477_v46, %v1468_v28 }
 0x243   :  { %v471_v52 = vpop.xlane.xlu0 %470 }
 0x244   :  { %v529_v54 = vsel %vm528_vm4, %v507_v49, %v527_v50  ;;  %v481_v55 = vadd.f32 %v473_v24, %v471_v52 }
 0x245   :  { %v531_v57 = vsel %vm1640_vm5, %v511_v51, %v529_v54 }
 0x246   :  { %v523_v58 = vrot.slane %v481_v55, %v1468_v28  ;;  %v533_v59 = vsel %vm1639_vm6, %v515_v53, %v531_v57 }
 0x247   :  { %v535_v60 = vsel %vm1638_vm7, %v519_v56, %v533_v59 }
 0x248   :  { %v537_v61 = vsel %vm1637_vm8, %v523_v58, %v535_v60 }
 0x249   :  { %v540_v62 = vsel %vm539_vm9, %v537_v61, -inf }
 0x24a   :  { %541 = vmax.xlane.f32.xlu1 %v540_v62 }
 0x2d7   :  { %v542_v5 = vpop.xlane.xlu1 %541 }
 0x2d8   :  { %v547_v7 = vrot.slane %v542_v5, %v1433_v3  ;;  %v551_v8 = vrot.slane %v542_v5, %v550_v0  ;;  %v555_v9 = vrot.slane %v542_v5, %v554_v2  ;;  %v559_v14 = vrot.slane %v542_v5, %v558_v4 }
 0x2d9   :  { %v563_v19 = vrot.slane %v542_v5, %v562_v12  ;;  %v567_v24 = vrot.slane %v542_v5, %v566_v18 }
 0x2da   :  { %v584_v11 = vsub.f32 %v474_v30, %v547_v7  ;;  %v585_v10 = vsub.f32 %v475_v25, %v551_v8  ;;  %v586_v15 = vsub.f32 %v476_v31, %v555_v9  ;;  %v587_v20 = vsub.f32 %v477_v46, %v559_v14 }
 0x2db   :  { %v588_v25 = vsub.f32 %v478_v36, %v563_v19  ;;  %v571_v30 = vrot.slane %v542_v5, %v570_v22  ;;  %v589_v31 = vsub.f32 %v1473_v45, %v567_v24  ;;  %v575_v36 = vrot.slane %v542_v5, %v574_v27 }
 0x2dc   :  { %v592_v16 = vmul.f32 1.442695, %v584_v11  ;;  %v594_v17 = vmul.f32 1.442695, %v585_v10  ;;  %v596_v21 = vmul.f32 1.442695, %v586_v15 }
 0x2dd   :  { %v598_v26 = vmul.f32 1.442695, %v587_v20  ;;  %v600_v32 = vmul.f32 1.442695, %v588_v25  ;;  %v590_v43 = vsub.f32 %v1475_v47, %v571_v30  ;;  %v602_v44 = vmul.f32 1.442695, %v589_v31 }
 0x2de   :  { %1153 = vpow2.f32 %v592_v16  ;;  %v591_v45 = vsub.f32 %v481_v55, %v575_v36 }
 0x2df   :  { %1155 = vpow2.f32 %v594_v17  ;;  %v604_v48 = vmul.f32 1.442695, %v590_v43 }
 0x2e0   :  { %1157 = vpow2.f32 %v596_v21  ;;  %v606_v50 = vmul.f32 1.442695, %v591_v45 }
 0x2e1   :  { %1159 = vpow2.f32 %v598_v26 }
 0x2e2   :  { %1161 = vpow2.f32 %v600_v32 }
 0x2e3   :  { %1163 = vpow2.f32 %v602_v44 }
 0x2e4   :  { %1165 = vpow2.f32 %v604_v48 }
 0x2e5   :  { %1167 = vpow2.f32 %v606_v50 }
 0x2e8   :  { %v1154_v33 = vpop.eup %1153 }
 0x2e9   :  { %v1513_v34 = vpop.eup %1155  ;;  %617 = vperm.xlu0 %1135, %v1154_v33  }
 0x2ea   :  { %620 = vperm.xlu1 %1136, %v1513_v34   ;;  %v1519_v46 = vpop.eup %1157 }
 0x2eb   :  { %v1522_v49 = vpop.eup %1159 }
 0x2ec   :  { %v1525_v51 = vpop.eup %1161 }
 0x2ed   :  { %v1528_v47 = vpop.eup %1163 }
 0x2ee   :  { %623 = vperm.xlu1 %1136, %v1519_v46   ;;  %v1531_v52 = vpop.eup %1165 }
 0x2ef   :  { %v1534_v53 = vpop.eup %1167 }
 0x2f2   :  { %626 = vperm.xlu1 %1136, %v1522_v49  }
 0x2f6   :  { %629 = vperm.xlu1 %1136, %v1525_v51  }
 0x2fa   :  { %632 = vperm.xlu1 %1136, %v1528_v47  }
 0x2fe   :  { %635 = vperm.xlu1 %1136, %v1531_v52  }
 0x302   :  { %638 = vperm.xlu1 %1136, %v1534_v53  }
 0x368   :  { %v618_v58 = vpop.permute.xlu0 %617 }
 0x369   :  { %v621_v54 = vpop.permute.xlu1 %620  ;;  %v643_v61 = vrot.slane %v618_v58, %v1468_v28 }
 0x36a   :  { %v647_v60 = vrot.slane %v621_v54, %v1468_v28 }
 0x36c   :  { %v672_v8 = vsel %vm524_vm2, %v647_v60, %v643_v61 }
 0x36d   :  { %v624_v55 = vpop.permute.xlu1 %623 }
 0x36e   :  { %v651_v62 = vrot.slane %v624_v55, %v1468_v28 }
 0x370   :  { %v673_v11 = vsel %vm526_vm3, %v651_v62, %v672_v8 }
 0x371   :  { %v627_v56 = vpop.permute.xlu1 %626 }
 0x372   :  { %v655_v63 = vrot.slane %v627_v56, %v1468_v28 }
 0x374   :  { %v674_v14 = vsel %vm528_vm4, %v655_v63, %v673_v11 }
 0x375   :  { %v630_v57 = vpop.permute.xlu1 %629 }
 0x376   :  { %v659_v5 = vrot.slane %v630_v57, %v1468_v28  ;;  %v850_v57 = vand.u32 31, %v1461_v23 }
 0x378   :  { %v675_v15 = vsel %vm1640_vm5, %v659_v5, %v674_v14  ;;  %vm852_vm13 = vcmp.eq.s32.totalorder %v850_v57, %v1370_v6 }
 0x379   :  { %v633_v59 = vpop.permute.xlu1 %632 }
 0x37a   :  { %v663_v9 = vrot.slane %v633_v59, %v1468_v28 }
 0x37c   :  { %v676_v17 = vsel %vm1639_vm6, %v663_v9, %v675_v15 }
 0x37d   :  { %v636_v7 = vpop.permute.xlu1 %635 }
 0x37e   :  { %v667_v10 = vrot.slane %v636_v7, %v1468_v28 }
 0x380   :  { %v677_v20 = vsel %vm1638_vm7, %v667_v10, %v676_v17 }
 0x381   :  { %v639_v16 = vpop.permute.xlu1 %638 }
 0x382   :  { %v671_v19 = vrot.slane %v639_v16, %v1468_v28 }
 0x384   :  { %v678_v21 = vsel %vm1637_vm8, %v671_v19, %v677_v20 }
 0x385   :  { %v680_v24 = vsel %vm539_vm9, %v678_v21, 0.0 }
 0x386   :  { %681 = vadd.xlane.f32.xlu1 %v680_v24 }
 0x413   :  { %v682_v25 = vpop.xlane.xlu1 %681 }
 0x414   :  { %v687_v26 = vrot.slane %v682_v25, %v1433_v3  ;;  %v691_v30 = vrot.slane %v682_v25, %v550_v0  ;;  %v695_v31 = vrot.slane %v682_v25, %v554_v2  ;;  %v699_v28 = vrot.slane %v682_v25, %v558_v4 }
 0x415   :  { %v703_v36 = vrot.slane %v682_v25, %v562_v12  ;;  %v707_v3 = vrot.slane %v682_v25, %v566_v18  ;;  %v711_v2 = vrot.slane %v682_v25, %v570_v22  ;;  %v715_v12 = vrot.slane %v682_v25, %v574_v27 }
 0x416   :  { %1169 = vrcp.f32 %v687_v26  ;;  %v1576_v27 = vadd.s32 128, %v1461_v23 }
 0x417   :  { %1171 = vrcp.f32 %v691_v30 }
 0x418   :  { %1173 = vrcp.f32 %v695_v31 }
 0x419   :  { %1175 = vrcp.f32 %v699_v28 }
 0x41a   :  { %1177 = vrcp.f32 %v703_v36 }
 0x41b   :  { %1179 = vrcp.f32 %v707_v3 }
 0x41c   :  { %1181 = vrcp.f32 %v711_v2 }
 0x41d   :  { %1183 = vrcp.f32 %v715_v12 }
 0x420   :  { %v1170_v32 = vpop.eup %1169 }
 0x421   :  { %v725_v43 = vmul.f32 %v1170_v32, %v1154_v33  ;;  %v1172_v44 = vpop.eup %1171 }
 0x422   :  { %v727_v0 = vmul.f32 %v1172_v44, %v1513_v34  ;;  %v1174_v45 = vpop.eup %1173 }
 0x423   :  { %742 = vperm.xlu0 %1135, %v725_v43   ;;  %v729_v4 = vmul.f32 %v1174_v45, %v1519_v46  ;;  %v1176_v48 = vpop.eup %1175 }
 0x424   :  { %v731_v33 = vmul.f32 %v1176_v48, %v1522_v49  ;;  %v1178_v50 = vpop.eup %1177  ;;  %v847_v49 = vadd.s32 8, %v1370_v6 }
 0x425   :  { %v733_v18 = vmul.f32 %v1178_v50, %v1525_v51  ;;  %v1180_v34 = vpop.eup %1179  ;;  %v851_v51 = vand.u32 31, %v1576_v27 }
 0x426   :  { %v735_v54 = vmul.f32 %v1180_v34, %v1528_v47  ;;  %v1182_v22 = vpop.eup %1181  ;;  %v848_v47 = vadd.s32 16, %v1370_v6  ;;  %vm854_vm14 = vcmp.eq.s32.totalorder %v850_v57, %v847_v49 }
 0x427   :  { %747 = vperm.xlu0 %1135, %v727_v0   ;;  %v737_v46 = vmul.f32 %v1182_v22, %v1531_v52  ;;  %v1184_v55 = vpop.eup %1183  ;;  %vm853_vm10 = vcmp.eq.s32.totalorder %v851_v51, %v1370_v6  ;;  %vm855_vm11 = vcmp.eq.s32.totalorder %v851_v51, %v847_v49  ;;  %v849_v52 = vadd.s32 24, %v1370_v6  ;;  %vm1110_vm15 = vmpackc.low %vm854_vm14, %vm852_vm13 }
 0x428   :  { %v739_v56 = vmul.f32 %v1184_v55, %v1534_v53  ;;  %vm1108_vm12 = vmpackc.low %vm855_vm11, %vm853_vm10  ;;  %v1292_v53 = vmov 1.0|1.0   ;;  %vm857_vm0 = vcmp.eq.s32.totalorder %v851_v51, %v848_v47  ;;  %vm856_vm8 = vcmp.eq.s32.totalorder %v850_v57, %v848_v47 }
 0x429   :  { %1109 = vmatprep.subr.msk.bf16.mxu1 %vm1108_vm12, %v1292_v53  ;;  %vm859_vm9 = vcmp.eq.s32.totalorder %v851_v51, %v849_v52  ;;  %vm858_vm7 = vcmp.eq.s32.totalorder %v850_v57, %v849_v52 }
 0x42a   :  { %1111 = vmatpush1.bf16.msk.msra.mxu1 %vm1110_vm15, %v1292_v53  ;;  %vm1112_vm6 = vmpackc.low %vm859_vm9, %vm857_vm0 }
 0x42b   :  { %752 = vperm.xlu0 %1135, %v729_v4   ;;  %1113 = vmatprep.subr.msk.bf16.mxu1 %vm1112_vm6, %v1292_v53  ;;  %vm1114_vm5 = vmpackc.low %vm858_vm7, %vm856_vm8  ;;  %vm1642_vm6 = vcmask 1045509   ;;  %vm1643_vm7 = vcmask 1046534   ;;  %vm1644_vm8 = vcmask 1047559  }
 0x42e   :  { %1115 = vmatpush1.bf16.msk.msra.mxu1 %vm1114_vm5, %v1292_v53  ;;  %vm1641_vm5 = vcmask 1044484  }
 0x42f   :  { %757 = vperm.xlu0 %1135, %v731_v33  }
 0x433   :  { %762 = vperm.xlu0 %1135, %v733_v18  }
 0x437   :  { %767 = vperm.xlu0 %1135, %v735_v54  }
 0x43b   :  { %772 = vperm.xlu0 %1135, %v737_v46  }
 0x43f   :  { %777 = vperm.xlu0 %1135, %v739_v56  }
 0x4a2   :  { %v743_v58 = vpop.permute.xlu0 %742 }
 0x4a3   :  { %v780_v62 = vmul.f32 %v743_v58, %v1398_v38 }
 0x4a5   :  { %v788_v9 = vsel %vm143_vm1, %v780_v62, 0.0 }
 0x4a6   :  { %v748_v59 = vpop.permute.xlu0 %747  ;;  %v789_v16 = vrot.slane %v788_v9, 4 }
 0x4a7   :  { %v781_v60 = vmul.f32 %v748_v59, %v1410_v40 }
 0x4a8   :  { %v790_v21 = vadd.f32 %v789_v16, %v788_v9 }
 0x4a9   :  { %v795_v5 = vsel %vm143_vm1, %v781_v60, 0.0 }
 0x4aa   :  { %v753_v61 = vpop.permute.xlu0 %752  ;;  %v796_v10 = vrot.slane %v795_v5, 4  ;;  %v791_v36 = vrot.slane %v790_v21, 2 }
 0x4ab   :  { %v782_v63 = vmul.f32 %v753_v61, %v1419_v41 }
 0x4ac   :  { %v797_v19 = vadd.f32 %v796_v10, %v795_v5  ;;  %v792_v12 = vadd.f32 %v791_v36, %v790_v21  ;;  %v964_v21 = vmul.u32 32, %v1370_v6 }
 0x4ad   :  { %v802_v7 = vsel %vm143_vm1, %v782_v63, 0.0 }
 0x4ae   :  { %v758_v8 = vpop.permute.xlu0 %757  ;;  %v803_v14 = vrot.slane %v802_v7, 4 }
 0x4af   :  { %v783_v11 = vmul.f32 %v758_v8, %v1425_v42  ;;  %v798_v42 = vrot.slane %v797_v19, 2 }
 0x4b0   :  { %v804_v41 = vadd.f32 %v803_v14, %v802_v7 }
 0x4b1   :  { %v809_v15 = vsel %vm143_vm1, %v783_v11, 0.0  ;;  %v799_v45 = vadd.f32 %v798_v42, %v797_v19 }
 0x4b2   :  { %v810_v40 = vrot.slane %v809_v15, 4  ;;  %v763_v17 = vpop.permute.xlu0 %762  ;;  %v805_v28 = vrot.slane %v804_v41, 2 }
 0x4b3   :  { %v784_v38 = vmul.f32 %v763_v17, %v1378_v29  ;;  %v800_v22 = vrot.slane %v799_v45, 1 }
 0x4b4   :  { %v811_v24 = vadd.f32 %v810_v40, %v809_v15  ;;  %v806_v4 = vadd.f32 %v805_v28, %v804_v41 }
 0x4b5   :  { %v816_v20 = vsel %vm143_vm1, %v784_v38, 0.0  ;;  %v801_v53 = vadd.f32 %v800_v22, %v799_v45 }
 0x4b6   :  { %v817_v25 = vrot.slane %v816_v20, 4  ;;  %v768_v26 = vpop.permute.xlu0 %767  ;;  %v812_v43 = vrot.slane %v811_v24, 2  ;;  %v807_v56 = vrot.slane %v806_v4, 1 }
 0x4b7   :  { %v785_v30 = vmul.f32 %v768_v26, %v1387_v35 }
 0x4b8   :  { %v818_v31 = vadd.f32 %v817_v25, %v816_v20  ;;  %v813_v33 = vadd.f32 %v812_v43, %v811_v24  ;;  %v808_v61 = vadd.f32 %v807_v56, %v806_v4  ;;  %v967_v20 = vadd.s32 1, %v1370_v6 }
 0x4b9   :  { %v823_v32 = vsel %vm143_vm1, %v785_v30, 0.0 }
 0x4ba   :  { %v824_v44 = vrot.slane %v823_v32, 4  ;;  %v773_v3 = vpop.permute.xlu0 %772  ;;  %v819_v29 = vrot.slane %v818_v31, 2  ;;  %v814_v51 = vrot.slane %v813_v33, 1  ;;  %v968_v24 = vmul.u32 32, %v967_v20 }
 0x4bb   :  { %v786_v0 = vmul.f32 %v773_v3, %v1394_v37  ;;  %v793_v37 = vrot.slane %v792_v12, 1 }
 0x4bc   :  { %v825_v2 = vadd.f32 %v824_v44, %v823_v32  ;;  %v820_v34 = vadd.f32 %v819_v29, %v818_v31  ;;  %v815_v63 = vadd.f32 %v814_v51, %v813_v33  ;;  %vm970_vm10 = vcmp.lt.s32.totalorder %v1576_v27, %v968_v24 }
 0x4bd   :  { %v830_v48 = vsel %vm143_vm1, %v786_v0, 0.0  ;;  %v794_v62 = vadd.f32 %v793_v37, %v792_v12 }
 0x4be   :  { %v826_v35 = vrot.slane %v825_v2, 2  ;;  %v831_v50 = vrot.slane %v830_v48, 4  ;;  %v778_v18 = vpop.permute.xlu0 %777  ;;  %v821_v52 = vrot.slane %v820_v34, 1 }
 0x4bf   :  { %v787_v54 = vmul.f32 %v778_v18, %v1406_v39  ;;  %v884_v8 = vsel %vm524_vm2, %v801_v53, %v794_v62  ;;  %vm965_vm2 = vcmp.ge.s32.totalorder %v1461_v23, %v964_v21 }
 0x4c0   :  { %v827_v46 = vadd.f32 %v826_v35, %v825_v2  ;;  %v832_v55 = vadd.f32 %v831_v50, %v830_v48  ;;  %v822_v7 = vadd.f32 %v821_v52, %v820_v34  ;;  %v885_v10 = vsel %vm526_vm3, %v808_v61, %v884_v8 }
 0x4c1   :  { %v837_v49 = vsel %vm143_vm1, %v787_v54, 0.0  ;;  %v886_v15 = vsel %vm528_vm4, %v815_v63, %v885_v10  ;;  %vm969_vm3 = vcmp.lt.s32.totalorder %v1461_v23, %v968_v24  ;;  %vm966_vm4 = vcmp.ge.s32.totalorder %v1576_v27, %v964_v21 }
 0x4c2   :  { %v833_v57 = vrot.slane %v832_v55, 2  ;;  %v838_v47 = vrot.slane %v837_v49, 4  ;;  %v828_v58 = vrot.slane %v827_v46, 1  ;;  %v887_v40 = vsel %vm1641_vm5, %v822_v7, %v886_v15  ;;  %vm971_vm11 = vmand %vm965_vm2, %vm969_vm3 }
 0x4c3   :  { %vm972_vm12 = vmand %vm966_vm4, %vm970_vm10 }
 0x4c4   :  { %v834_v59 = vadd.f32 %v833_v57, %v832_v55  ;;  %v839_v60 = vadd.f32 %v838_v47, %v837_v49  ;;  %v829_v9 = vadd.f32 %v828_v58, %v827_v46 }
 0x4c6   :  { %v835_v5 = vrot.slane %v834_v59, 1  ;;  %v840_v39 = vrot.slane %v839_v60, 2  ;;  %v888_v17 = vsel %vm1642_vm6, %v829_v9, %v887_v40 }
 0x4c8   :  { %v841_v11 = vadd.f32 %v840_v39, %v839_v60  ;;  %v836_v14 = vadd.f32 %v835_v5, %v834_v59 }
 0x4ca   :  { %v842_v16 = vrot.slane %v841_v11, 1  ;;  %v889_v19 = vsel %vm1643_vm7, %v836_v14, %v888_v17 }
 0x4cc   :  { %v843_v38 = vadd.f32 %v842_v16, %v841_v11 }
 0x4ce   :  { %v890_v41 = vsel %vm1644_vm8, %v843_v38, %v889_v19 }
 0x4cf   :  { %1053 = vmatmul.mubr.msk.f32.vlgmr.msra.gmra.mrb[8].mxu1 %vm143_vm1, %v890_v41  ;;  %vm1007_vm1 = vcmp.lt.s32.totalorder %v97_v1, 256 }
 0x5a2   :  { %v959_v25 = vpop.f32.mrb[8].mxu1 }
 0x5a3   :  { %v973_v26 = vsel %vm971_vm11, %v959_v25, 0.0  ;;  %v961_v30 = vpop.f32.mrb[9].mxu1 }
 0x5a4   :  { %v975_v42 = vrot.slane %v973_v26, 4  ;;  %v974_v31 = vsel %vm972_vm12, %v961_v30, 0.0 }
 0x5a5   :  { %v981_v28 = vrot.slane %v974_v31, 4 }
 0x5a6   :  { %v976_v32 = vadd.f32 %v975_v42, %v973_v26 }
 0x5a7   :  { %v982_v36 = vadd.f32 %v981_v28, %v974_v31 }
 0x5a8   :  { %v977_v6 = vrot.slane %v976_v32, 2 }
 0x5a9   :  { %v983_v43 = vrot.slane %v982_v36, 2 }
 0x5aa   :  { %v978_v44 = vadd.f32 %v977_v6, %v976_v32 }
 0x5ab   :  { %v984_v3 = vadd.f32 %v983_v43, %v982_v36 }
 0x5ac   :  { %v979_v29 = vrot.slane %v978_v44, 1 }
 0x5ad   :  { %v985_v23 = vrot.slane %v984_v3, 1 }
 0x5ae   :  { %v980_v0 = vadd.f32 %v979_v29, %v978_v44 }
 0x5af   :  { %v986_v45 = vadd.f32 %v985_v23, %v984_v3 }
 0x5b1   :  { %v989_v2 = vcombine.low %v980_v0, %v986_v45 }
 0x5b3   :  { %v996_v27 = vrot.slane %v989_v2, %v1373_v13 }
 0x5b5   :  { %v1003_v4 = vrot.slane %v996_v27, %v1373_v13 }
 0x5b7   :  { %1009 = vst.msk [vmem:[#allocation9] sm:$0x3] %vm1007_vm1, %v1003_v4 }
 0x5b8   :  { %1262 = shalt.err (!%p1259_p0)
}
 0x5b9   :  { %s1263_s19 = scalar_lea.hbm %s1636_s6, 32 }
 0x5ba   :  { %p1264_p1 = scmp.ne.s32.totalorder %s1636_s6, %s1263_s19  ;;  %p1267_p2 = scmp.lt.u32.totalorder %s1263_s19, %s1636_s6 }
 0x5bc   :  { %p1269_p3 = pnand %p1267_p2, %p1264_p1 }
 0x5be   :  { %1272 = shalt.err (!%p1269_p3)
}
 0x5bf   :  { %1019 = dma.vmem_to_hbm [thread:$0]  %s1017_s15, 32, %s1636_s6, [#allocation5]  }
 0x5c0   :  { %1277 = dma.done.wait [#allocation5], 32  }
 0x5c1   :  { %1278 = vsyncadd [#allocation5], 4294967264 }
 0x5c2   :  { %1023 = vsyncpa [#allocation4], 1 }
 0x5c3   :  { %1024 = vsyncpa [#allocation7], 1 }
 0x5c4   :  { %1025 = vsyncpa [#allocation5], 1 }

</bundles_post_ra>
